<compile_context>
chip_gen: v7x
topology: tpu7x:2x2x1
jax: 0.10.0
libtpu: 0.0.40
codegen_flags: <defaults>
</compile_context>

<pallas_src>
import jax
import jax.numpy as jnp
from jax.experimental import pallas as pl
from jax.experimental.pallas import tpu as pltpu

HIDDEN_SIZE = 768        # fixed in the PyTorch module
MAX_B_TILE = 1024        # rows per grid step when the batch is large (multiple of 8)


def _edl_head_kernel(cls_ref, num_ref, w_cls_ref, w_num_ref, b_ref, o_ref):
    # cls_ref: [Bt, 768]  num_ref: [Bt, F]  w_cls_ref: [768, C]  w_num_ref: [F, C]
    # b_ref:   [C] in SMEM            o_ref: [Bt, C]
    raw = jnp.dot(cls_ref[...], w_cls_ref[...],
                  preferred_element_type=jnp.float32)
    raw = raw + jnp.dot(num_ref[...], w_num_ref[...],
                        preferred_element_type=jnp.float32)

    # Bias from SMEM: C scalar reads broadcast with iota/select (C is static).
    col = jax.lax.broadcasted_iota(jnp.int32, raw.shape, 1)
    for c in range(raw.shape[1]):
        raw = raw + jnp.where(col == c, b_ref[c], jnp.float32(0.0))

    # F.softplus(raw) + 1   (numerically-stable softplus via logaddexp)
    alpha = jnp.logaddexp(raw, jnp.float32(0.0)) + 1.0
    o_ref[...] = alpha.astype(o_ref.dtype)


def edl_head(cls_emb, numeric, w_cls, w_num, b, *, b_tile=None):
    """cls_emb: [B, 768], numeric: [B, F], w_cls: [768, C], w_num: [F, C], b: [C]."""
    B, H = cls_emb.shape
    F = numeric.shape[1]
    C = w_cls.shape[1]
    assert w_cls.shape == (H, C) and w_num.shape == (F, C) and b.shape == (C,)

    if b_tile is None:
        b_tile = B if B <= MAX_B_TILE else MAX_B_TILE   # MAX_B_TILE is a multiple of 8
    grid = (pl.cdiv(B, b_tile),)

    return pl.pallas_call(
        _edl_head_kernel,
        out_shape=jax.ShapeDtypeStruct((B, C), jnp.float32),
        grid=grid,
        in_specs=[
            pl.BlockSpec((b_tile, H), lambda i: (i, 0)),   # CLS rows (K=768 lane-aligned)
            pl.BlockSpec((b_tile, F), lambda i: (i, 0)),   # numeric rows
            pl.BlockSpec((H, C), lambda i: (0, 0)),        # resident weights
            pl.BlockSpec((F, C), lambda i: (0, 0)),
            pl.BlockSpec(memory_space=pltpu.MemorySpace.SMEM),   # bias: scalar memory
        ],
        out_specs=pl.BlockSpec((b_tile, C), lambda i: (i, 0)),
        compiler_params=pltpu.CompilerParams(
            dimension_semantics=("parallel",)),
    )(cls_emb, numeric, w_cls, w_num, b)


def model_forward(last_hidden_state, numeric_features, w, b):
    """Mirrors Model.forward (eval mode, use_edl=True).

    last_hidden_state: [B, S, 768]  (stand-in for bert_model(...).last_hidden_state)
    numeric_features : [B, F] or None
    w: [768 + F, C] (or [768, C] when numeric_features is None), b: [C]
    """
    cls_embedding = last_hidden_state[:, 0, :]   # [B, 768]; dropout = identity in eval mode
    B = cls_embedding.shape[0]
    C = w.shape[1]

    if numeric_features is None:
        assert w.shape[0] == HIDDEN_SIZE, "w must be [768, C] when numeric_features is None"
        numeric_features = jnp.zeros((B, 8), dtype=cls_embedding.dtype)  # contributes zero
        w_cls, w_num = w, jnp.zeros((8, C), dtype=w.dtype)
    else:
        F = numeric_features.shape[1]
        assert w.shape[0] == HIDDEN_SIZE + F, "w first dim must be 768 + num_numeric_features"
        # Weight-prep-time split: fuses the concat into the kernel as two dots.
        w_cls, w_num = w[:HIDDEN_SIZE, :], w[HIDDEN_SIZE:, :]

    return edl_head(cls_embedding, numeric_features, w_cls, w_num, b)


if __name__ == "__main__":
    key = jax.random.PRNGKey(0)
    k1, k2, k3, k4 = jax.random.split(key, 4)

    B = 2                     # batch
    S = 8                     # sequence length
    NUM_NUMERIC = 8           # args.num_numeric_features
    NUM_CLASSES = 2           # args.num_classes
    D = HIDDEN_SIZE + NUM_NUMERIC

    # deterministic synthetic "BERT" output + numeric features
    last_hidden_state = jax.random.normal(k1, (B, S, HIDDEN_SIZE), dtype=jnp.float32)
    numeric_features = jax.random.normal(k2, (B, NUM_NUMERIC), dtype=jnp.float32)

    # deterministic classifier (EDLHead.linear) parameters
    bound = 1.0 / jnp.sqrt(jnp.float32(D))
    w = jax.random.uniform(k3, (D, NUM_CLASSES), minval=-bound, maxval=bound,
                           dtype=jnp.float32)
    b = jax.random.uniform(k4, (NUM_CLASSES,), minval=-bound, maxval=bound,
                           dtype=jnp.float32)

    out = model_forward(last_hidden_state, numeric_features, w, b)
    out = jax.block_until_ready(out)

    # reference check in plain JAX (original concatenated formulation)
    x_ref = jnp.concatenate([last_hidden_state[:, 0, :], numeric_features], axis=1)
    ref = jax.nn.softplus(x_ref @ w + b) + 1.0
    assert out.shape == (B, NUM_CLASSES)
    assert jnp.allclose(out, ref, atol=1e-5, rtol=1e-5)

    print("KERNEL_OK")
</pallas_src>

<mosaic_0001>
module attributes {stable_mosaic.version = 11 : i64} {
  func.func @_edl_head_kernel(%arg0: i32, %arg1: memref<2x768xf32, #tpu.memory_space<vmem>>, %arg2: memref<2x8xf32, #tpu.memory_space<vmem>>, %arg3: memref<768x2xf32, #tpu.memory_space<vmem>>, %arg4: memref<8x2xf32, #tpu.memory_space<vmem>>, %arg5: memref<2xf32, #tpu.memory_space<smem>>, %arg6: memref<2x2xf32, #tpu.memory_space<vmem>>) attributes {dimension_semantics = [#tpu.dimension_semantics<parallel>], iteration_bounds = array<i64: 1>, scalar_prefetch = 0 : i64, scratch_operands = 0 : i64, tpu.core_type = #tpu.core_type<tc>, window_params = [{transform_indices = @transform_0, window_bounds = array<i64: 2, 768>}, {transform_indices = @transform_1, window_bounds = array<i64: 2, 8>}, {pipeline_mode = #tpu.pipeline_mode<synchronous>, transform_indices = @transform_2, window_bounds = array<i64: 768, 2>}, {pipeline_mode = #tpu.pipeline_mode<synchronous>, transform_indices = @transform_3, window_bounds = array<i64: 8, 2>}, {transform_indices = @transform_4, window_bounds = array<i64: 2>}, {transform_indices = @transform_5, window_bounds = array<i64: 2, 2>}]} {
    %c0 = arith.constant 0 : index
    %c0_0 = arith.constant 0 : index
    %0 = vector.load %arg1[%c0, %c0_0] : memref<2x768xf32, #tpu.memory_space<vmem>>, vector<2x768xf32>
    %c0_1 = arith.constant 0 : index
    %c0_2 = arith.constant 0 : index
    %1 = vector.load %arg3[%c0_1, %c0_2] : memref<768x2xf32, #tpu.memory_space<vmem>>, vector<768x2xf32>
    %cst = arith.constant dense<0.000000e+00> : vector<2x2xf32>
    %2 = tpu.matmul %0, %1, %cst {dimension_numbers = #tpu.dot_dimension_numbers<[1], [0], [0], [1], [0, 0, 1, 1], [], []>} : vector<2x768xf32>, vector<768x2xf32>, vector<2x2xf32> -> vector<2x2xf32>
    %c0_3 = arith.constant 0 : index
    %c0_4 = arith.constant 0 : index
    %3 = vector.load %arg2[%c0_3, %c0_4] : memref<2x8xf32, #tpu.memory_space<vmem>>, vector<2x8xf32>
    %c0_5 = arith.constant 0 : index
    %c0_6 = arith.constant 0 : index
    %4 = vector.load %arg4[%c0_5, %c0_6] : memref<8x2xf32, #tpu.memory_space<vmem>>, vector<8x2xf32>
    %cst_7 = arith.constant dense<0.000000e+00> : vector<2x2xf32>
    %5 = tpu.matmul %3, %4, %cst_7 {dimension_numbers = #tpu.dot_dimension_numbers<[1], [0], [0], [1], [0, 0, 1, 1], [], []>} : vector<2x8xf32>, vector<8x2xf32>, vector<2x2xf32> -> vector<2x2xf32>
    %6 = arith.addf %2, %5 : vector<2x2xf32>
    %7 = tpu.iota {dimensions = array<i32: 1>} : vector<2x2xi32>
    %c0_i32 = arith.constant 0 : i32
    %8 = vector.broadcast %c0_i32 : i32 to vector<2x2xi32>
    %9 = arith.cmpi eq, %7, %8 : vector<2x2xi32>
    %c0_8 = arith.constant 0 : index
    %10 = memref.load %arg5[%c0_8] : memref<2xf32, #tpu.memory_space<smem>>
    %cst_9 = arith.constant 0.000000e+00 : f32
    %11 = vector.broadcast %10 : f32 to vector<2x2xf32>
    %12 = vector.broadcast %cst_9 : f32 to vector<2x2xf32>
    %13 = arith.select %9, %11, %12 : vector<2x2xi1>, vector<2x2xf32>
    %14 = arith.addf %6, %13 : vector<2x2xf32>
    %c1_i32 = arith.constant 1 : i32
    %15 = vector.broadcast %c1_i32 : i32 to vector<2x2xi32>
    %16 = arith.cmpi eq, %7, %15 : vector<2x2xi32>
    %c1 = arith.constant 1 : index
    %17 = memref.load %arg5[%c1] : memref<2xf32, #tpu.memory_space<smem>>
    %cst_10 = arith.constant 0.000000e+00 : f32
    %18 = vector.broadcast %17 : f32 to vector<2x2xf32>
    %19 = vector.broadcast %cst_10 : f32 to vector<2x2xf32>
    %20 = arith.select %16, %18, %19 : vector<2x2xi1>, vector<2x2xf32>
    %21 = arith.addf %14, %20 : vector<2x2xf32>
    %cst_11 = arith.constant 0.000000e+00 : f32
    %22 = vector.broadcast %cst_11 : f32 to vector<2x2xf32>
    %23 = arith.maximumf %21, %22 : vector<2x2xf32>
    %24 = vector.broadcast %cst_11 : f32 to vector<2x2xf32>
    %25 = arith.subf %21, %24 : vector<2x2xf32>
    %26 = arith.cmpf one, %25, %25 : vector<2x2xf32>
    %27 = vector.broadcast %cst_11 : f32 to vector<2x2xf32>
    %28 = arith.addf %21, %27 : vector<2x2xf32>
    %29 = math.absf %25 : vector<2x2xf32>
    %cst_12 = arith.constant 0.000000e+00 : f32
    %30 = vector.broadcast %cst_12 : f32 to vector<2x2xf32>
    %31 = arith.subf %30, %29 : vector<2x2xf32>
    %32 = math.exp %31 : vector<2x2xf32>
    %33 = math.log1p %32 : vector<2x2xf32>
    %34 = arith.addf %23, %33 : vector<2x2xf32>
    %35 = arith.select %26, %28, %34 : vector<2x2xi1>, vector<2x2xf32>
    %cst_13 = arith.constant 1.000000e+00 : f32
    %36 = vector.broadcast %cst_13 : f32 to vector<2x2xf32>
    %37 = arith.addf %35, %36 : vector<2x2xf32>
    %c0_14 = arith.constant 0 : index
    %c0_15 = arith.constant 0 : index
    %38 = vector.load %arg6[%c0_14, %c0_15] : memref<2x2xf32, #tpu.memory_space<vmem>>, vector<2x2xf32>
    tpu.vector_store %arg6[%c0_14, %c0_15], %37 {strides = array<i32>} : memref<2x2xf32, #tpu.memory_space<vmem>>, vector<2x2xf32>,
    return
  }
  func.func @transform_0(%arg0: i32) -> (i32, i32) {
    %c0_i32 = arith.constant 0 : i32
    %c0_i32_0 = arith.constant 0 : i32
    return %arg0, %c0_i32 : i32, i32
  }
  func.func @transform_1(%arg0: i32) -> (i32, i32) {
    %c0_i32 = arith.constant 0 : i32
    %c0_i32_0 = arith.constant 0 : i32
    return %arg0, %c0_i32 : i32, i32
  }
  func.func @transform_2(%arg0: i32) -> (i32, i32) {
    %c0_i32 = arith.constant 0 : i32
    %c0_i32_0 = arith.constant 0 : i32
    %c0_i32_1 = arith.constant 0 : i32
    return %c0_i32, %c0_i32_0 : i32, i32
  }
  func.func @transform_3(%arg0: i32) -> (i32, i32) {
    %c0_i32 = arith.constant 0 : i32
    %c0_i32_0 = arith.constant 0 : i32
    %c0_i32_1 = arith.constant 0 : i32
    return %c0_i32, %c0_i32_0 : i32, i32
  }
  func.func @transform_4(%arg0: i32) -> i32 {
    %c0_i32 = arith.constant 0 : i32
    %c0_i32_0 = arith.constant 0 : i32
    return %c0_i32 : i32
  }
  func.func @transform_5(%arg0: i32) -> (i32, i32) {
    %c0_i32 = arith.constant 0 : i32
    %c0_i32_0 = arith.constant 0 : i32
    return %arg0, %c0_i32 : i32, i32
  }
}

</mosaic_0001>

<bundles_post_ra>
// kernel: tpu_custom_call.1
= control target key start
LH: loop header
LB: loop body
LE: loop exit
PB: predicated region body
PF: predicated region fallthrough
CT: control target
= control target key end

     0   :  { %10 = vsyncpa [#allocation4], 0  ;;  %s1111_s0 = inlined_call_operand.vmem [shape: f32[2,768], index: 0, kind: input, shape index: {}]   ;;  %s1112_s1 = inlined_call_operand.vmem [shape: f32[2,8], index: 1, kind: input, shape index: {}]   ;;  %s1113_s2 = inlined_call_operand.vmem [shape: f32[768,2], index: 2, kind: input, shape index: {}]   ;;  %s1114_s3 = inlined_call_operand.vmem [shape: f32[8,2], index: 3, kind: input, shape index: {}]   ;;  %s1115_s4 = inlined_call_operand.vmem [shape: f32[2], index: 4, kind: input, shape index: {}]   ;;  %s1116_s5 = inlined_call_operand.hbm [shape: f32[2,2], index: 5, kind: output, shape index: {}]  }
   0x1   :  { %11 = vsyncpa [#allocation3], 0  ;;  %s26_s20 = sshll.u32 %s1115_s4, 4  ;;  %s27_s20 = int_to_ptr.vmem [resolvable:$true] %s26_s20 }
   0x2   :  { %s720_s21 = scalar_lea.vmem %s27_s20, 16  ;;  %p725_p1 = scmp.lt.s32.totalorder %s27_s20, %s27_s20 }
   0x3   :  { %p721_p0 = scmp.ne.s32.totalorder %s27_s20, %s720_s21  ;;  %p726_p2 = scmp.lt.s32.totalorder %s720_s21, %s720_s21 }
   0x5   :  { %p727_p3 = por %p726_p2, %p725_p1 }
   0x7   :  { %p728_p4 = pnand %p727_p3, %p721_p0 }
   0x9   :  { %731 = shalt.err (!%p728_p4)
}
   0xa   :  { %s758_s22 = smov [#allocation2]  }
   0xb   :  { %29 = dma.vmem_to_smem %s27_s20, 16, %s758_s22, [#allocation4]  }
   0xc   :  { %754 = dma.done.wait [#allocation4], 16  }
   0xd   :  { %755 = vsyncadd [#allocation4], 4294967280 }
   0xe   :  { %33 = sfence }
   0xf   :  { %v52_v0 = vld [vmem:[%s1113_s2 + $0x80] sm:$0xff]  ;;  %v53_v1 = vld [vmem:[%s1113_s2 + $0x88] sm:$0xff]  ;;  %vm134_vm0 = vcmask 64512   ;;  %v759_v3 = vmov 0.0   ;;  %vm760_vm1 = vmmov 0   ;;  %v54_v14 = vld [vmem:[%s1113_s2 + $0x90] sm:$0xff]  ;;  %v214_v49 = vlaneseq }
  0x10   :  { %v133_v2 = vld [vmem:[%s1114_s3] sm:$0xff]  ;;  %609 = vmatprep.subr.mxu0 %v759_v3  ;;  %v614_v4 = vpack.c.bf16 %v53_v1, %v52_v0  ;;  %v37_v6 = vld [vmem:[%s1113_s2 + $0x8] sm:$0xff]  ;;  %611 = vmatprep.mubr.msk.f32.mxu0 %vm760_vm1, %v759_v3  ;;  %v55_v15 = vld [vmem:[%s1113_s2 + $0x98] sm:$0xff]  ;;  %v761_v47 = vmov 1983009808   ;;  %s454_s25 = sld [smem:[#allocation2]] }
  0x11   :  { %v36_v5 = vld [vmem:[%s1113_s2] sm:$0xff]  ;;  %610 = vmatpush3.msra.mxu0 %v133_v2  ;;  %v85_v9 = vld [vmem:[%s1113_s2 + $0x188] sm:$0xff]  ;;  %v618_v17 = vpack.c.bf16 %v55_v15, %v54_v14  ;;  %v38_v18 = vld [vmem:[%s1113_s2 + $0x10] sm:$0xff]  ;;  %v212_v48 = vunpack.c.l.s4 %v761_v47  ;;  %v215_v0 = vshrl.u32 %v214_v49, 7  ;;  %s501_s26 = sld [smem:[#allocation2 + $0x1]]  ;;  %vm482_vm6 = vcmask 9216  }
  0x12   :  { %v84_v7 = vld [vmem:[%s1113_s2 + $0x180] sm:$0xff]  ;;  %v616_v8 = vpack.c.bf16 %v37_v6, %v36_v5  ;;  %615 = vmatprep.subr.bf16.mxu1 %v614_v4  ;;  %v69_v13 = vld [vmem:[%s1113_s2 + $0x108] sm:$0xff]  ;;  %v39_v19 = vld [vmem:[%s1113_s2 + $0x18] sm:$0xff] }
  0x13   :  { %v132_v10 = vld [vmem:[%s1112_s1] sm:$0x3]  ;;  %v646_v12 = vpack.c.bf16 %v85_v9, %v84_v7  ;;  %v86_v20 = vld [vmem:[%s1113_s2 + $0x190] sm:$0xff]  ;;  %v620_v21 = vpack.c.bf16 %v39_v19, %v38_v18  ;;  %v87_v22 = vld [vmem:[%s1113_s2 + $0x198] sm:$0xff]  ;;  %v213_v63 = vunpack.c.0.s8 %v212_v48 }
  0x14   :  { %v68_v11 = vld [vmem:[%s1113_s2 + $0x100] sm:$0xff]  ;;  %612 = vmatmul.mubr.msk.f32.vlgmr.msra.gmra.mrb[0].mxu0 %vm134_vm0, %v132_v10  ;;  %617 = vmatpush3.bf16.msra.mxu1 %v616_v8  ;;  %v70_v23 = vld [vmem:[%s1113_s2 + $0x110] sm:$0xff]  ;;  %v71_v24 = vld [vmem:[%s1113_s2 + $0x118] sm:$0xff]  ;;  %v650_v25 = vpack.c.bf16 %v87_v22, %v86_v20 }
  0x15   :  { %v648_v16 = vpack.c.bf16 %v69_v13, %v68_v11  ;;  %647 = vmatprep.subr.bf16.mxu0 %v646_v12  ;;  %619 = vmatprep.subr.bf16.mxu1 %v618_v17  ;;  %v652_v26 = vpack.c.bf16 %v71_v24, %v70_v23  ;;  %v56_v27 = vld [vmem:[%s1113_s2 + $0xa0] sm:$0xff]  ;;  %v57_v28 = vld [vmem:[%s1113_s2 + $0xa8] sm:$0xff]  ;;  %v58_v38 = vld [vmem:[%s1113_s2 + $0xb0] sm:$0xff]  ;;  %v216_v13 = vsub.s32 %v213_v63, %v215_v0 }
  0x16   :  { %v40_v29 = vld [vmem:[%s1113_s2 + $0x20] sm:$0xff]  ;;  %v622_v30 = vpack.c.bf16 %v57_v28, %v56_v27  ;;  %v41_v31 = vld [vmem:[%s1113_s2 + $0x28] sm:$0xff]  ;;  %v59_v39 = vld [vmem:[%s1113_s2 + $0xb8] sm:$0xff] }
  0x17   :  { %649 = vmatpush3.bf16.msra.mxu0 %v648_v16  ;;  %v88_v32 = vld [vmem:[%s1113_s2 + $0x1a0] sm:$0xff]  ;;  %v89_v33 = vld [vmem:[%s1113_s2 + $0x1a8] sm:$0xff]  ;;  %v624_v34 = vpack.c.bf16 %v41_v31, %v40_v29  ;;  %v42_v40 = vld [vmem:[%s1113_s2 + $0x30] sm:$0xff]  ;;  %v626_v43 = vpack.c.bf16 %v59_v39, %v58_v38 }
  0x18   :  { %621 = vmatpush3.bf16.msra.mxu1 %v620_v21  ;;  %651 = vmatprep.subr.bf16.mxu0 %v650_v25  ;;  %v654_v35 = vpack.c.bf16 %v89_v33, %v88_v32  ;;  %v72_v36 = vld [vmem:[%s1113_s2 + $0x120] sm:$0xff]  ;;  %v73_v37 = vld [vmem:[%s1113_s2 + $0x128] sm:$0xff]  ;;  %v43_v41 = vld [vmem:[%s1113_s2 + $0x38] sm:$0xff] }
  0x19   :  { %623 = vmatprep.subr.bf16.mxu1 %v622_v30  ;;  %v656_v42 = vpack.c.bf16 %v73_v37, %v72_v36  ;;  %v90_v44 = vld [vmem:[%s1113_s2 + $0x1b0] sm:$0xff]  ;;  %v91_v45 = vld [vmem:[%s1113_s2 + $0x1b8] sm:$0xff]  ;;  %v60_v52 = vld [vmem:[%s1113_s2 + $0xc0] sm:$0xff]  ;;  %v628_v54 = vpack.c.bf16 %v43_v41, %v42_v40 }
  0x1a   :  { %v74_v46 = vld [vmem:[%s1113_s2 + $0x130] sm:$0xff]  ;;  %v658_v50 = vpack.c.bf16 %v91_v45, %v90_v44  ;;  %v75_v51 = vld [vmem:[%s1113_s2 + $0x138] sm:$0xff]  ;;  %v61_v53 = vld [vmem:[%s1113_s2 + $0xc8] sm:$0xff] }
  0x1b   :  { %653 = vmatpush3.bf16.msra.mxu0 %v652_v26  ;;  %v92_v55 = vld [vmem:[%s1113_s2 + $0x1c0] sm:$0xff]  ;;  %v630_v56 = vpack.c.bf16 %v61_v53, %v60_v52  ;;  %v45_v58 = vld [vmem:[%s1113_s2 + $0x48] sm:$0xff]  ;;  %v660_v60 = vpack.c.bf16 %v75_v51, %v74_v46  ;;  %v62_v61 = vld [vmem:[%s1113_s2 + $0xd0] sm:$0xff] }
  0x1c   :  { %655 = vmatprep.subr.bf16.mxu0 %v654_v35  ;;  %625 = vmatpush3.bf16.msra.mxu1 %v624_v34  ;;  %v44_v57 = vld [vmem:[%s1113_s2 + $0x40] sm:$0xff]  ;;  %v93_v59 = vld [vmem:[%s1113_s2 + $0x1c8] sm:$0xff]  ;;  %v63_v62 = vld [vmem:[%s1113_s2 + $0xd8] sm:$0xff] }
  0x1d   :  { %627 = vmatprep.subr.bf16.mxu1 %v626_v43  ;;  %v662_v1 = vpack.c.bf16 %v93_v59, %v92_v55  ;;  %v76_v2 = vld [vmem:[%s1113_s2 + $0x140] sm:$0xff]  ;;  %v77_v3 = vld [vmem:[%s1113_s2 + $0x148] sm:$0xff]  ;;  %v632_v4 = vpack.c.bf16 %v45_v58, %v44_v57  ;;  %v94_v5 = vld [vmem:[%s1113_s2 + $0x1d0] sm:$0xff]  ;;  %v634_v7 = vpack.c.bf16 %v63_v62, %v62_v61 }
  0x1e   :  { %v95_v6 = vld [vmem:[%s1113_s2 + $0x1d8] sm:$0xff]  ;;  %v46_v8 = vld [vmem:[%s1113_s2 + $0x50] sm:$0xff]  ;;  %v664_v10 = vpack.c.bf16 %v77_v3, %v76_v2  ;;  %v64_v11 = vld [vmem:[%s1113_s2 + $0xe0] sm:$0xff] }
  0x1f   :  { %657 = vmatpush3.bf16.msra.mxu0 %v656_v42  ;;  %v47_v9 = vld [vmem:[%s1113_s2 + $0x58] sm:$0xff]  ;;  %v65_v12 = vld [vmem:[%s1113_s2 + $0xe8] sm:$0xff]  ;;  %v666_v14 = vpack.c.bf16 %v95_v6, %v94_v5  ;;  %v78_v15 = vld [vmem:[%s1113_s2 + $0x150] sm:$0xff] }
  0x20   :  { %659 = vmatprep.subr.bf16.mxu0 %v658_v50  ;;  %629 = vmatpush3.bf16.msra.mxu1 %v628_v54  ;;  %v79_v16 = vld [vmem:[%s1113_s2 + $0x158] sm:$0xff]  ;;  %v636_v17 = vpack.c.bf16 %v47_v9, %v46_v8  ;;  %v96_v18 = vld [vmem:[%s1113_s2 + $0x1e0] sm:$0xff]  ;;  %v97_v19 = vld [vmem:[%s1113_s2 + $0x1e8] sm:$0xff]  ;;  %v638_v20 = vpack.c.bf16 %v65_v12, %v64_v11 }
  0x21   :  { %631 = vmatprep.subr.bf16.mxu1 %v630_v56  ;;  %v48_v21 = vld [vmem:[%s1113_s2 + $0x60] sm:$0xff]  ;;  %v49_v22 = vld [vmem:[%s1113_s2 + $0x68] sm:$0xff]  ;;  %v668_v24 = vpack.c.bf16 %v79_v16, %v78_v15  ;;  %v66_v25 = vld [vmem:[%s1113_s2 + $0xf0] sm:$0xff]  ;;  %v670_v29 = vpack.c.bf16 %v97_v19, %v96_v18 }
  0x22   :  { %v34_v23 = vld [vmem:[%s1111_s0] sm:$0xff]  ;;  %v67_v26 = vld [vmem:[%s1113_s2 + $0xf8] sm:$0xff]  ;;  %v81_v31 = vld [vmem:[%s1113_s2 + $0x168] sm:$0xff]  ;;  %v640_v32 = vpack.c.bf16 %v49_v22, %v48_v21 }
  0x23   :  { %661 = vmatpush3.bf16.msra.mxu0 %v660_v60  ;;  %v210_v27 = vcombine.high %v34_v23, %v34_v23  ;;  %v217_v28 = vrot.slane %v34_v23, %v216_v13  ;;  %v80_v30 = vld [vmem:[%s1113_s2 + $0x160] sm:$0xff]  ;;  %v98_v33 = vld [vmem:[%s1113_s2 + $0x1f0] sm:$0xff]  ;;  %v99_v34 = vld [vmem:[%s1113_s2 + $0x1f8] sm:$0xff]  ;;  %v642_v37 = vpack.c.bf16 %v67_v26, %v66_v25 }
  0x24   :  { %663 = vmatprep.subr.bf16.mxu0 %v662_v1  ;;  %633 = vmatpush3.bf16.msra.mxu1 %v632_v4  ;;  %v50_v38 = vld [vmem:[%s1113_s2 + $0x70] sm:$0xff]  ;;  %v51_v39 = vld [vmem:[%s1113_s2 + $0x78] sm:$0xff]  ;;  %v672_v40 = vpack.c.bf16 %v81_v31, %v80_v30  ;;  %v116_v41 = vld [vmem:[%s1113_s2 + $0x280] sm:$0xff]  ;;  %v674_v44 = vpack.c.bf16 %v99_v34, %v98_v33 }
  0x25   :  { %635 = vmatprep.subr.bf16.mxu1 %v634_v7  ;;  %v225_v35 = vcombine.high %v217_v28, %v217_v28  ;;  %v224_v36 = vrot.slane %v210_v27, %v216_v13  ;;  %v117_v42 = vld [vmem:[%s1113_s2 + $0x288] sm:$0xff]  ;;  %v82_v45 = vld [vmem:[%s1113_s2 + $0x170] sm:$0xff]  ;;  %v83_v46 = vld [vmem:[%s1113_s2 + $0x178] sm:$0xff]  ;;  %v644_v47 = vpack.c.bf16 %v51_v39, %v50_v38 }
  0x26   :  { %v678_v48 = vpack.c.bf16 %v117_v42, %v116_v41  ;;  %v100_v50 = vld [vmem:[%s1113_s2 + $0x200] sm:$0xff]  ;;  %v101_v51 = vld [vmem:[%s1113_s2 + $0x208] sm:$0xff]  ;;  %v676_v52 = vpack.c.bf16 %v83_v46, %v82_v45  ;;  %v118_v53 = vld [vmem:[%s1113_s2 + $0x290] sm:$0xff]  ;;  %v455_v46 = vstv %s454_s25 }
  0x27   :  { %665 = vmatpush3.bf16.msra.mxu0 %v664_v10  ;;  %305 = vmatprep.mubr.f32.mxu1 %v225_v35  ;;  %v226_v43 = vcombine.high %v224_v36, %v224_v36  ;;  %v119_v54 = vld [vmem:[%s1113_s2 + $0x298] sm:$0xff]  ;;  %v680_v55 = vpack.c.bf16 %v101_v51, %v100_v50  ;;  %v102_v57 = vld [vmem:[%s1113_s2 + $0x210] sm:$0xff]  ;;  %v500_v59 = vld.sshfl [vmem:[%s1111_s0 + $0x8] sm:$0x33 pattern:$0x76325410]  ;;  %v460_v50 = vstv %s501_s26 }
  0x28   :  { %667 = vmatprep.subr.bf16.mxu0 %v666_v14  ;;  %637 = vmatpush3.bf16.msra.mxu1 %v636_v17  ;;  %v682_v56 = vpack.c.bf16 %v119_v54, %v118_v53  ;;  %v103_v58 = vld [vmem:[%s1113_s2 + $0x218] sm:$0xff]  ;;  %v120_v60 = vld [vmem:[%s1113_s2 + $0x2a0] sm:$0xff]  ;;  %v121_v61 = vld [vmem:[%s1113_s2 + $0x2a8] sm:$0xff]  ;;  %v234_v62 = vcombine.high %v500_v59, %v500_v59 }
  0x29   :  { %639 = vmatprep.subr.bf16.mxu1 %v638_v20  ;;  %375 = vmatprep.mubr.f32.mxu0 %v226_v43  ;;  %v684_v63 = vpack.c.bf16 %v103_v58, %v102_v57  ;;  %v686_v0 = vpack.c.bf16 %v121_v61, %v120_v60  ;;  %v104_v1 = vld [vmem:[%s1113_s2 + $0x220] sm:$0xff]  ;;  %v105_v2 = vld [vmem:[%s1113_s2 + $0x228] sm:$0xff]  ;;  %v122_v3 = vld [vmem:[%s1113_s2 + $0x2b0] sm:$0xff] }
  0x2a   :  { %v123_v4 = vld [vmem:[%s1113_s2 + $0x2b8] sm:$0xff]  ;;  %v688_v5 = vpack.c.bf16 %v105_v2, %v104_v1  ;;  %v106_v7 = vld [vmem:[%s1113_s2 + $0x230] sm:$0xff]  ;;  %v124_v9 = vld [vmem:[%s1113_s2 + $0x2c0] sm:$0xff] }
  0x2b   :  { %669 = vmatpush3.bf16.msra.mxu0 %v668_v24  ;;  %v690_v6 = vpack.c.bf16 %v123_v4, %v122_v3  ;;  %v107_v8 = vld [vmem:[%s1113_s2 + $0x238] sm:$0xff]  ;;  %v125_v10 = vld [vmem:[%s1113_s2 + $0x2c8] sm:$0xff]  ;;  %v108_v13 = vld [vmem:[%s1113_s2 + $0x240] sm:$0xff] }
  0x2c   :  { %671 = vmatprep.subr.bf16.mxu0 %v670_v29  ;;  %641 = vmatpush3.bf16.msra.mxu1 %v640_v32  ;;  %v692_v11 = vpack.c.bf16 %v107_v8, %v106_v7  ;;  %v694_v12 = vpack.c.bf16 %v125_v10, %v124_v9  ;;  %v109_v14 = vld [vmem:[%s1113_s2 + $0x248] sm:$0xff]  ;;  %v126_v15 = vld [vmem:[%s1113_s2 + $0x2d0] sm:$0xff]  ;;  %v127_v16 = vld [vmem:[%s1113_s2 + $0x2d8] sm:$0xff] }
  0x2d   :  { %643 = vmatprep.subr.bf16.mxu1 %v642_v37  ;;  %v696_v17 = vpack.c.bf16 %v109_v14, %v108_v13  ;;  %v698_v18 = vpack.c.bf16 %v127_v16, %v126_v15  ;;  %v110_v19 = vld [vmem:[%s1113_s2 + $0x250] sm:$0xff]  ;;  %v111_v20 = vld [vmem:[%s1113_s2 + $0x258] sm:$0xff]  ;;  %v128_v21 = vld [vmem:[%s1113_s2 + $0x2e0] sm:$0xff] }
  0x2e   :  { %v129_v22 = vld [vmem:[%s1113_s2 + $0x2e8] sm:$0xff]  ;;  %v700_v23 = vpack.c.bf16 %v111_v20, %v110_v19  ;;  %v112_v25 = vld [vmem:[%s1113_s2 + $0x260] sm:$0xff]  ;;  %v130_v27 = vld [vmem:[%s1113_s2 + $0x2f0] sm:$0xff] }
  0x2f   :  { %673 = vmatpush3.bf16.msra.mxu0 %v672_v40  ;;  %v702_v24 = vpack.c.bf16 %v129_v22, %v128_v21  ;;  %v113_v26 = vld [vmem:[%s1113_s2 + $0x268] sm:$0xff]  ;;  %v114_v31 = vld [vmem:[%s1113_s2 + $0x270] sm:$0xff]  ;;  %v115_v32 = vld [vmem:[%s1113_s2 + $0x278] sm:$0xff] }
  0x30   :  { %675 = vmatprep.subr.bf16.mxu0 %v674_v44  ;;  %645 = vmatpush3.bf16.msra.mxu1 %v644_v47  ;;  %v704_v29 = vpack.c.bf16 %v113_v26, %v112_v25  ;;  %v708_v33 = vpack.c.bf16 %v115_v32, %v114_v31  ;;  %v452_v44 = vand.u32 127, %v214_v49 }
  0x31   :  { %679 = vmatprep.subr.bf16.mxu1 %v678_v48 }
  0x32   :  { %vm453_vm2 = vcmp.eq.s32.totalorder %v452_v44, 0  ;;  %vm458_vm3 = vcmp.eq.s32.totalorder %v452_v44, 1 }
  0x33   :  { %677 = vmatpush3.bf16.msra.mxu0 %v676_v52  ;;  %306 = vmatmul.mubr.f32.vlgmr.msra.gmra.mrb[0].mxu1 %v217_v28  ;;  %v131_v28 = vld [vmem:[%s1113_s2 + $0x2f8] sm:$0xff]  ;;  %v456_v51 = vsel %vm453_vm2, %v455_v46, 0.0  ;;  %v461_v53 = vsel %vm458_vm3, %v460_v50, 0.0  ;;  %s762_s2 = smov [#allocation5]  }
  0x34   :  { %681 = vmatpush3.bf16.msra.mxu1 %v680_v55  ;;  %445 = vmatprep.mubr.f32.mxu1 %v234_v62  ;;  %v706_v30 = vpack.c.bf16 %v131_v28, %v130_v27  ;;  %s490_s4 = sshll.u32 %s762_s2, 4  ;;  %s491_s4 = int_to_ptr.vmem [resolvable:$true] %s490_s4 }
  0x35   :  { %683 = vmatprep.subr.bf16.mxu1 %v682_v56  ;;  %s732_s27 = scalar_lea.vmem %s491_s4, 32  ;;  %p737_p6 = scmp.lt.s32.totalorder %s491_s4, %s491_s4 }
  0x36   :  { %376 = vmatmul.mubr.f32.vlgmr.msra.gmra.mrb[2].mxu0 %v224_v36  ;;  %p733_p5 = scmp.ne.s32.totalorder %s491_s4, %s732_s27  ;;  %p738_p7 = scmp.lt.s32.totalorder %s732_s27, %s732_s27 }
  0x38   :  { %685 = vmatpush3.bf16.msra.mxu1 %v684_v63  ;;  %p739_p8 = por %p738_p7, %p737_p6 }
  0x39   :  { %687 = vmatprep.subr.bf16.mxu1 %v686_v0 }
  0x3a   :  { %p740_p9 = pnand %p739_p8, %p733_p5 }
  0x3c   :  { %689 = vmatpush3.bf16.msra.mxu1 %v688_v5 }
  0x3d   :  { %691 = vmatprep.subr.bf16.mxu1 %v690_v6 }
  0x40   :  { %693 = vmatpush3.bf16.msra.mxu1 %v692_v11 }
  0x41   :  { %695 = vmatprep.subr.bf16.mxu1 %v694_v12 }
  0x44   :  { %697 = vmatpush3.bf16.msra.mxu1 %v696_v17 }
  0x45   :  { %699 = vmatprep.subr.bf16.mxu1 %v698_v18 }
  0x48   :  { %701 = vmatpush3.bf16.msra.mxu1 %v700_v23 }
  0x49   :  { %703 = vmatprep.subr.bf16.mxu1 %v702_v24 }
  0x4c   :  { %705 = vmatpush3.bf16.msra.mxu1 %v704_v29 }
  0x4d   :  { %707 = vmatprep.subr.bf16.mxu1 %v706_v30 }
  0x50   :  { %709 = vmatpush3.bf16.msra.mxu1 %v708_v33 }
  0x53   :  { %446 = vmatmul.mubr.f32.vlgmr.msra.gmra.mrb[2].mxu1 %v500_v59 }
  0xe7   :  { %v204_v34 = vpop.f32.mrb[0].mxu0 }
  0xe8   :  { %v613_v35 = vpop.f32.mrb[1].mxu0 }
 0x106   :  { %v536_v36 = vpop.f32.mrb[0].mxu1 }
 0x107   :  { %v537_v37 = vpop.f32.mrb[1].mxu1 }
 0x108   :  { %v538_v38 = vadd.f32 %v537_v37, %v536_v36 }
 0x109   :  { %v571_v39 = vpop.f32.mrb[2].mxu0 }
 0x10a   :  { %v572_v40 = vpop.f32.mrb[3].mxu0  ;;  %v308_v41 = vadd.f32 %v538_v38, %v204_v34 }
 0x10b   :  { %v573_v42 = vadd.f32 %v572_v40, %v571_v39 }
 0x10d   :  { %v378_v43 = vadd.f32 %v573_v42, %v308_v41 }
 0x126   :  { %v606_v45 = vpop.f32.mrb[2].mxu1 }
 0x127   :  { %v607_v47 = vpop.f32.mrb[3].mxu1 }
 0x128   :  { %v608_v48 = vadd.f32 %v607_v47, %v606_v45 }
 0x12a   :  { %v448_v52 = vadd.f32 %v608_v48, %v378_v43 }
 0x12c   :  { %v457_v54 = vadd.f32 %v456_v51, %v448_v52 }
 0x12e   :  { %v462_v55 = vadd.f32 %v461_v53, %v457_v54 }
 0x130   :  { %v466_v56 = vand.u32 2147483647, %v462_v55  ;;  %v463_v2 = vmax.f32 %v462_v55, 0.0  ;;  %vm464_vm5 = vcmp.ne.f32.partialorder %v462_v55, %v462_v55 }
 0x132   :  { %v467_v57 = vsub.f32 0.0, %v466_v56 }
 0x134   :  { %v468_v58 = vmul.f32 1.442695, %v467_v57 }
 0x136   :  { %716 = vpow2.f32 %v468_v58 }
 0x140   :  { %v717_v59 = vpop.eup %716 }
 0x141   :  { %v470_v60 = vadd.f32 1.0, %v717_v59  ;;  %v473_v49 = vmul.f32 -0.5, %v717_v59  ;;  %v476_v62 = vand.u32 2147483647, %v717_v59 }
 0x143   :  { %718 = vlog2.f32 %v470_v60  ;;  %v474_v61 = vadd.f32 1.0, %v473_v49  ;;  %vm477_vm4 = vcmp.lt.f32.partialorder %v476_v62, 0.0004427343 }
 0x145   :  { %v475_v1 = vmul.f32 %v717_v59, %v474_v61 }
 0x14d   :  { %v719_v63 = vpop.eup %718 }
 0x14e   :  { %v472_v0 = vmul.f32 0.6931472, %v719_v63 }
 0x150   :  { %v478_v3 = vsel %vm477_vm4, %v475_v1, %v472_v0 }
 0x151   :  { %v479_v4 = vadd.f32 %v478_v3, %v463_v2 }
 0x153   :  { %v480_v5 = vsel %vm464_vm5, %v462_v55, %v479_v4 }
 0x154   :  { %v481_v6 = vadd.f32 1.0, %v480_v5 }
 0x156   :  { %483 = vst.msk [vmem:[#allocation5] sm:$0x3] %vm482_vm6, %v481_v6 }
 0x157   :  { %743 = shalt.err (!%p740_p9)
}
 0x158   :  { %s744_s30 = scalar_lea.hbm %s1116_s5, 32 }
 0x159   :  { %p745_p10 = scmp.ne.s32.totalorder %s1116_s5, %s744_s30  ;;  %p748_p11 = scmp.lt.u32.totalorder %s744_s30, %s1116_s5 }
 0x15b   :  { %p750_p12 = pnand %p748_p11, %p745_p10 }
 0x15d   :  { %753 = shalt.err (!%p750_p12)
}
 0x15e   :  { %493 = dma.vmem_to_hbm [thread:$0]  %s491_s4, 32, %s1116_s5, [#allocation3]  }
 0x15f   :  { %756 = dma.done.wait [#allocation3], 32  }
 0x160   :  { %757 = vsyncadd [#allocation3], 4294967264 }
 0x161   :  { %497 = vsyncpa [#allocation3], 1 }
 0x162   :  { %498 = vsyncpa [#allocation4], 1 }

</bundles_post_ra>
